<compile_context>
chip_gen: v7x
topology: tpu7x:2x2x1
jax: 0.10.0
libtpu: 0.0.40
codegen_flags: <defaults>
</compile_context>

<pallas_src>
import math

import jax
import jax.numpy as jnp
from jax.experimental import pallas as pl
from jax.experimental.pallas import tpu as pltpu

_LANES = 128
_SUBLANES = 8
_TARGET_TILE_BYTES = 2 * 1024 * 1024  # ~2 MiB per input tile (safe on v7x too)


def _surrogate_partial_kernel(lp_ref, olp_ref, pg_ref, part_ref):
    """Per-block partial sums of ratio * pg (global negation folded into wrapper)."""
    lp = lp_ref[...].astype(jnp.float32)
    olp = olp_ref[...].astype(jnp.float32)
    pg = pg_ref[...].astype(jnp.float32)
    loss = jnp.exp(lp - olp) * pg                       # (block_rows, 128)
    r = loss.shape[0]
    # Fold the block to one vreg-shaped (8,128) partial: reshape is tile-aligned,
    # the sum over the leading axis is plain elementwise vreg adds (VPU only).
    folded = loss.reshape(r // _SUBLANES, _SUBLANES, _LANES)
    part_ref[...] = jnp.sum(folded, axis=0)             # (8, 128)


def _surrogate_none_kernel(lp_ref, olp_ref, pg_ref, out_ref):
    lp = lp_ref[...].astype(jnp.float32)
    olp = olp_ref[...].astype(jnp.float32)
    pg = pg_ref[...].astype(jnp.float32)
    out_ref[...] = (-(jnp.exp(lp - olp) * pg)).astype(out_ref.dtype)


def _choose_block_rows(rows_needed, itemsize):
    """Largest multiple-of-8 row count with tile bytes <= target (and <= data)."""
    max_rows = max(_SUBLANES,
                   (_TARGET_TILE_BYTES // (_LANES * itemsize)) // _SUBLANES * _SUBLANES)
    needed = ((rows_needed + _SUBLANES - 1) // _SUBLANES) * _SUBLANES
    return min(max_rows, needed)


def _prepare(x, padded_n):
    """Flatten, zero-pad to padded_n elements, reshape to (rows, 128)."""
    flat = x.reshape(-1)
    pad = padded_n - flat.shape[0]
    if pad:
        flat = jnp.concatenate([flat, jnp.zeros((pad,), dtype=flat.dtype)])
    return flat.reshape(padded_n // _LANES, _LANES)


def surrogate_loss(log_probs, old_log_probs, policy_gradient_term, reduction="sum"):
    """Pallas implementation of SurrogateLoss.forward (elementwise, any shape)."""
    assert log_probs.shape == old_log_probs.shape == policy_gradient_term.shape
    orig_shape = log_probs.shape
    n = int(math.prod(orig_shape)) if orig_shape else 1
    itemsize = jnp.dtype(log_probs.dtype).itemsize

    rows_needed = max(1, pl.cdiv(n, _LANES))
    block_rows = _choose_block_rows(rows_needed, itemsize)
    grid_len = pl.cdiv(rows_needed, block_rows)
    rows = grid_len * block_rows
    padded_n = rows * _LANES

    lp = _prepare(log_probs, padded_n)
    olp = _prepare(old_log_probs, padded_n)
    pg = _prepare(policy_gradient_term, padded_n)

    in_spec = pl.BlockSpec((block_rows, _LANES), lambda i: (i, 0))
    tile_bytes = block_rows * _LANES * itemsize
    # 3 inputs x 2 pipeline buffers x tile + output + slack; capped far below
    # v7x's 64 MiB physical VMEM.
    vmem_limit = min(48 * 1024 * 1024,
                     max(16 * 1024 * 1024, 3 * 2 * tile_bytes + 4 * 1024 * 1024))

    if reduction in ("sum", "mean"):
        cost = pl.CostEstimate(
            flops=3 * padded_n,
            transcendentals=padded_n,
            bytes_accessed=3 * padded_n * itemsize + grid_len * _SUBLANES * _LANES * 4,
        )
        partials = pl.pallas_call(
            _surrogate_partial_kernel,
            out_shape=jax.ShapeDtypeStruct((grid_len * _SUBLANES, _LANES), jnp.float32),
            grid_spec=pltpu.PrefetchScalarGridSpec(
                num_scalar_prefetch=0,
                grid=(grid_len,),
                in_specs=[in_spec, in_spec, in_spec],
                out_specs=pl.BlockSpec((_SUBLANES, _LANES), lambda i: (i, 0)),
            ),
            compiler_params=pltpu.CompilerParams(
                dimension_semantics=("parallel",),
                vmem_limit_bytes=vmem_limit),
            cost_estimate=cost,
        )(lp, olp, pg)
        total = -jnp.sum(partials)          # single final reduce + negation
        if reduction == "mean":
            return total / n
        return total

    elif reduction == "none":
        out_dtype = log_probs.dtype
        cost = pl.CostEstimate(
            flops=2 * padded_n,
            transcendentals=padded_n,
            bytes_accessed=(3 * itemsize + jnp.dtype(out_dtype).itemsize) * padded_n,
        )
        out = pl.pallas_call(
            _surrogate_none_kernel,
            out_shape=jax.ShapeDtypeStruct((rows, _LANES), out_dtype),
            grid_spec=pltpu.PrefetchScalarGridSpec(
                num_scalar_prefetch=0,
                grid=(grid_len,),
                in_specs=[in_spec, in_spec, in_spec],
                out_specs=pl.BlockSpec((block_rows, _LANES), lambda i: (i, 0)),
            ),
            compiler_params=pltpu.CompilerParams(
                dimension_semantics=("parallel",),
                vmem_limit_bytes=vmem_limit),
            cost_estimate=cost,
        )(lp, olp, pg)
        return out.reshape(-1)[:n].reshape(orig_shape)

    else:
        raise ValueError(f"unknown reduction: {reduction}")


if __name__ == "__main__":
    key = jax.random.PRNGKey(0)
    k1, k2, k3 = jax.random.split(key, 3)

    # Small 1-D batch of per-sample terms (non-tile-aligned to exercise padding).
    N = 1000
    log_probs = jax.random.normal(k1, (N,), dtype=jnp.float32) * 0.1 - 1.0
    old_log_probs = jax.random.normal(k2, (N,), dtype=jnp.float32) * 0.1 - 1.0
    pg_term = jax.random.normal(k3, (N,), dtype=jnp.float32)

    # Pure-JAX reference.
    ratio = jnp.exp(log_probs - old_log_probs)
    ref_loss = -ratio * pg_term

    out_sum = jax.block_until_ready(surrogate_loss(log_probs, old_log_probs, pg_term, "sum"))
    out_mean = jax.block_until_ready(surrogate_loss(log_probs, old_log_probs, pg_term, "mean"))
    out_none = jax.block_until_ready(surrogate_loss(log_probs, old_log_probs, pg_term, "none"))

    assert jnp.allclose(out_sum, jnp.sum(ref_loss), rtol=1e-5, atol=1e-4), (out_sum, jnp.sum(ref_loss))
    assert jnp.allclose(out_mean, jnp.mean(ref_loss), rtol=1e-5, atol=1e-4), (out_mean, jnp.mean(ref_loss))
    assert jnp.allclose(out_none, ref_loss, rtol=1e-5, atol=1e-5)

    # bf16 inputs are accepted (upcast in-kernel, f32 accumulation).
    lp_bf, olp_bf, pg_bf = (log_probs.astype(jnp.bfloat16),
                            old_log_probs.astype(jnp.bfloat16),
                            pg_term.astype(jnp.bfloat16))
    ref_bf = jnp.sum(-(jnp.exp(lp_bf.astype(jnp.float32) - olp_bf.astype(jnp.float32))
                       * pg_bf.astype(jnp.float32)))
    out_bf = jax.block_until_ready(surrogate_loss(lp_bf, olp_bf, pg_bf, "sum"))
    assert jnp.allclose(out_bf, ref_bf, rtol=1e-3, atol=1e-3), (out_bf, ref_bf)

    print("KERNEL_OK")
</pallas_src>

<mosaic_0001>
module attributes {stable_mosaic.version = 11 : i64} {
  func.func @_surrogate_partial_kernel(%arg0: i32, %arg1: memref<8x128xf32, #tpu.memory_space<vmem>>, %arg2: memref<8x128xf32, #tpu.memory_space<vmem>>, %arg3: memref<8x128xf32, #tpu.memory_space<vmem>>, %arg4: memref<8x128xf32, #tpu.memory_space<vmem>>) attributes {dimension_semantics = [#tpu.dimension_semantics<parallel>], iteration_bounds = array<i64: 1>, scalar_prefetch = 0 : i64, scratch_operands = 0 : i64, tpu.core_type = #tpu.core_type<tc>, window_params = [{transform_indices = @transform_0, window_bounds = array<i64: 8, 128>}, {transform_indices = @transform_1, window_bounds = array<i64: 8, 128>}, {transform_indices = @transform_2, window_bounds = array<i64: 8, 128>}, {transform_indices = @transform_3, window_bounds = array<i64: 8, 128>}]} {
    %c0 = arith.constant 0 : index
    %c0_0 = arith.constant 0 : index
    %0 = vector.load %arg1[%c0, %c0_0] : memref<8x128xf32, #tpu.memory_space<vmem>>, vector<8x128xf32>
    %c0_1 = arith.constant 0 : index
    %c0_2 = arith.constant 0 : index
    %1 = vector.load %arg2[%c0_1, %c0_2] : memref<8x128xf32, #tpu.memory_space<vmem>>, vector<8x128xf32>
    %c0_3 = arith.constant 0 : index
    %c0_4 = arith.constant 0 : index
    %2 = vector.load %arg3[%c0_3, %c0_4] : memref<8x128xf32, #tpu.memory_space<vmem>>, vector<8x128xf32>
    %3 = arith.subf %0, %1 : vector<8x128xf32>
    %4 = math.exp %3 : vector<8x128xf32>
    %5 = arith.mulf %4, %2 : vector<8x128xf32>
    %6 = vector.shape_cast %5 : vector<8x128xf32> to vector<1x8x128xf32>
    %cst = arith.constant dense<0.000000e+00> : vector<8x128xf32>
    %7 = vector.multi_reduction <add>, %6, %cst [0] : vector<1x8x128xf32> to vector<8x128xf32>
    %c0_5 = arith.constant 0 : index
    %c0_6 = arith.constant 0 : index
    %8 = vector.load %arg4[%c0_5, %c0_6] : memref<8x128xf32, #tpu.memory_space<vmem>>, vector<8x128xf32>
    tpu.vector_store %arg4[%c0_5, %c0_6], %7 {strides = array<i32>} : memref<8x128xf32, #tpu.memory_space<vmem>>, vector<8x128xf32>,
    return
  }
  func.func @transform_0(%arg0: i32) -> (i32, i32) {
    %c0_i32 = arith.constant 0 : i32
    %c0_i32_0 = arith.constant 0 : i32
    return %arg0, %c0_i32 : i32, i32
  }
  func.func @transform_1(%arg0: i32) -> (i32, i32) {
    %c0_i32 = arith.constant 0 : i32
    %c0_i32_0 = arith.constant 0 : i32
    return %arg0, %c0_i32 : i32, i32
  }
  func.func @transform_2(%arg0: i32) -> (i32, i32) {
    %c0_i32 = arith.constant 0 : i32
    %c0_i32_0 = arith.constant 0 : i32
    return %arg0, %c0_i32 : i32, i32
  }
  func.func @transform_3(%arg0: i32) -> (i32, i32) {
    %c0_i32 = arith.constant 0 : i32
    %c0_i32_0 = arith.constant 0 : i32
    return %arg0, %c0_i32 : i32, i32
  }
}

</mosaic_0001>

<bundles_post_ra>
// kernel: tpu_custom_call.1
= control target key start
LH: loop header
LB: loop body
LE: loop exit
PB: predicated region body
PF: predicated region fallthrough
CT: control target
= control target key end

     0   :  { %8 = vsyncpa [#allocation3], 0  ;;  %s247_s0 = inlined_call_operand.hbm [shape: f32[8,128], index: 0, kind: input, shape index: {}]   ;;  %s248_s1 = inlined_call_operand.hbm [shape: f32[8,128], index: 1, kind: input, shape index: {}]   ;;  %s249_s2 = inlined_call_operand.hbm [shape: f32[8,128], index: 2, kind: input, shape index: {}]   ;;  %s250_s3 = inlined_call_operand.hbm [shape: f32[8,128], index: 3, kind: output, shape index: {}]  }
   0x1   :  { %9 = vsyncpa [#allocation6], 0 }
   0x2   :  { %10 = vsyncpa [#allocation4], 0  ;;  %s175_s12 = smov [#allocation5]   ;;  %s176_s14 = smov [#allocation2]  }
   0x3   :  { %s27_s13 = sshll.u32 %s175_s12, 4  ;;  %s17_s15 = sshll.u32 %s176_s14, 4  ;;  %s28_s13 = int_to_ptr.vmem [resolvable:$true] %s27_s13  ;;  %s18_s15 = int_to_ptr.vmem [resolvable:$true] %s17_s15 }
   0x4   :  { %s81_s18 = scalar_lea.hbm %s248_s1, 128 }
   0x5   :  { %p82_p0 = scmp.ne.s32.totalorder %s248_s1, %s81_s18  ;;  %p85_p1 = scmp.lt.u32.totalorder %s81_s18, %s248_s1 }
   0x7   :  { %p87_p2 = pnand %p85_p1, %p82_p0 }
   0x9   :  { %90 = shalt.err (!%p87_p2)
}
   0xa   :  { %s91_s23 = scalar_lea.vmem %s28_s13, 128  ;;  %p96_p4 = scmp.lt.s32.totalorder %s28_s13, %s28_s13 }
   0xb   :  { %p92_p3 = scmp.ne.s32.totalorder %s28_s13, %s91_s23  ;;  %p97_p5 = scmp.lt.s32.totalorder %s91_s23, %s91_s23 }
   0xd   :  { %p98_p6 = por %p97_p5, %p96_p4 }
   0xf   :  { %p99_p7 = pnand %p98_p6, %p92_p3 }
  0x11   :  { %102 = shalt.err (!%p99_p7)
}
  0x12   :  { %30 = dma.hbm_to_vmem [thread:$0]  %s248_s1, 128, %s28_s13, [#allocation6]  }
  0x13   :  { %s103_s28 = scalar_lea.hbm %s247_s0, 128 }
  0x14   :  { %p104_p8 = scmp.ne.s32.totalorder %s247_s0, %s103_s28  ;;  %p107_p9 = scmp.lt.u32.totalorder %s103_s28, %s247_s0 }
  0x16   :  { %p109_p10 = pnand %p107_p9, %p104_p8 }
  0x18   :  { %112 = shalt.err (!%p109_p10)
}
  0x19   :  { %s113_s6 = scalar_lea.vmem %s18_s15, 128  ;;  %p118_p12 = scmp.lt.s32.totalorder %s18_s15, %s18_s15 }
  0x1a   :  { %p114_p11 = scmp.ne.s32.totalorder %s18_s15, %s113_s6  ;;  %p119_p13 = scmp.lt.s32.totalorder %s113_s6, %s113_s6 }
  0x1c   :  { %p120_p0 = por %p119_p13, %p118_p12 }
  0x1e   :  { %p121_p1 = pnand %p120_p0, %p114_p11 }
  0x20   :  { %124 = shalt.err (!%p121_p1)
}
  0x21   :  { %20 = dma.hbm_to_vmem [thread:$0]  %s247_s0, 128, %s18_s15, [#allocation3]  }
  0x22   :  { %s177_s8 = smov [#allocation7]   ;;  %s125_s12 = scalar_lea.hbm %s249_s2, 128 }
  0x23   :  { %s37_s9 = sshll.u32 %s177_s8, 4  ;;  %p126_p2 = scmp.ne.s32.totalorder %s249_s2, %s125_s12  ;;  %s38_s9 = int_to_ptr.vmem [resolvable:$true] %s37_s9 }
  0x24   :  { %p129_p3 = scmp.lt.u32.totalorder %s125_s12, %s249_s2 }
  0x26   :  { %p131_p4 = pnand %p129_p3, %p126_p2 }
  0x28   :  { %134 = shalt.err (!%p131_p4)
}
  0x29   :  { %s135_s18 = scalar_lea.vmem %s38_s9, 128  ;;  %p140_p6 = scmp.lt.s32.totalorder %s38_s9, %s38_s9 }
  0x2a   :  { %p136_p5 = scmp.ne.s32.totalorder %s38_s9, %s135_s18  ;;  %p141_p7 = scmp.lt.s32.totalorder %s135_s18, %s135_s18 }
  0x2c   :  { %p142_p8 = por %p141_p7, %p140_p6 }
  0x2e   :  { %p143_p9 = pnand %p142_p8, %p136_p5 }
  0x30   :  { %146 = shalt.err (!%p143_p9)
}
  0x31   :  { %40 = dma.hbm_to_vmem [thread:$0]  %s249_s2, 128, %s38_s9, [#allocation6]  }
  0x32   :  { %169 = dma.done.wait [#allocation3], 128  }
  0x33   :  { %170 = vsyncadd [#allocation3], 4294967168 }
  0x34   :  { %171 = dma.done.wait [#allocation6], 256  }
  0x35   :  { %172 = vsyncadd [#allocation6], 4294967040  ;;  %v50_v0 = vld [vmem:[#allocation2] sm:$0xff]  ;;  %v51_v1 = vld [vmem:[#allocation5] sm:$0xff]  ;;  %s178_s19 = smov [#allocation8]  }
  0x36   :  { %v53_v2 = vsub.f32 %v50_v0, %v51_v1  ;;  %v52_v4 = vld [vmem:[#allocation7] sm:$0xff]  ;;  %s65_s20 = sshll.u32 %s178_s19, 4  ;;  %s66_s20 = int_to_ptr.vmem [resolvable:$true] %s65_s20 }
  0x37   :  { %s147_s21 = scalar_lea.vmem %s66_s20, 128  ;;  %p152_p11 = scmp.lt.s32.totalorder %s66_s20, %s66_s20 }
  0x38   :  { %v54_v3 = vmul.f32 1.442695, %v53_v2  ;;  %p148_p10 = scmp.ne.s32.totalorder %s66_s20, %s147_s21  ;;  %p153_p12 = scmp.lt.s32.totalorder %s147_s21, %s147_s21 }
  0x3a   :  { %79 = vpow2.f32 %v54_v3  ;;  %p154_p13 = por %p153_p12, %p152_p11 }
  0x3c   :  { %p155_p0 = pnand %p154_p13, %p148_p10 }
  0x44   :  { %v80_v5 = vpop.eup %79 }
  0x45   :  { %v56_v6 = vmul.f32 %v80_v5, %v52_v4 }
  0x47   :  { %58 = vst [vmem:[#allocation8] sm:$0xff] %v56_v6 }
  0x48   :  { %158 = shalt.err (!%p155_p0)
}
  0x49   :  { %s159_s23 = scalar_lea.hbm %s250_s3, 128 }
  0x4a   :  { %p160_p1 = scmp.ne.s32.totalorder %s250_s3, %s159_s23  ;;  %p163_p2 = scmp.lt.u32.totalorder %s159_s23, %s250_s3 }
  0x4c   :  { %p165_p3 = pnand %p163_p2, %p160_p1 }
  0x4e   :  { %168 = shalt.err (!%p165_p3)
}
  0x4f   :  { %68 = dma.vmem_to_hbm [thread:$0]  %s66_s20, 128, %s250_s3, [#allocation4]  }
  0x50   :  { %173 = dma.done.wait [#allocation4], 128  }
  0x51   :  { %174 = vsyncadd [#allocation4], 4294967168 }
  0x52   :  { %72 = vsyncpa [#allocation3], 1 }
  0x53   :  { %73 = vsyncpa [#allocation6], 1 }
  0x54   :  { %74 = vsyncpa [#allocation4], 1 }

</bundles_post_ra>
